<compile_context>
chip_gen: v6e
topology: v6e:2x2x1
jax: 0.10.0
libtpu: 0.0.40
codegen_flags: <defaults>
</compile_context>

<pallas_src>
import jax
import jax.numpy as jnp
from jax.experimental import pallas as pl
from jax.experimental.pallas import tpu as pltpu


# ---------------------------------------------------------------------------
# Path 1: module-native (B, K) layout -- batch on sublanes, K on lanes.
# ---------------------------------------------------------------------------
def _rows_kernel(x_ref, w_ref, b_ref, o_ref):
    # x_ref: (TB, K) VMEM, w_ref: (1, K) VMEM, b_ref: (1,) SMEM, o_ref: (TB, 1) VMEM
    x = x_ref[...]                                     # (TB, K) f32
    w = w_ref[...]                                     # (1, K)  PyTorch (out, in), out == 1
    acc = jnp.sum(x * w, axis=-1, keepdims=True)       # VPU multiply + lane (XLU) reduce
    o_ref[...] = (acc + b_ref[0]).astype(o_ref.dtype)  # scalar bias from SMEM


# ---------------------------------------------------------------------------
# Path 2: batch-on-lanes layout -- x pre-transposed to (K, B).
# ---------------------------------------------------------------------------
def _lanes_kernel(xt_ref, w_ref, b_ref, o_ref):
    # xt_ref: (K, TB) VMEM, w_ref: (K, 1) VMEM, b_ref: (1,) SMEM, o_ref: (1, TB) VMEM
    xt = xt_ref[...]                                   # (K, TB) batch on the 128-lane axis
    w = w_ref[...]                                     # (K, 1)  broadcast along lanes
    acc = jnp.sum(xt * w, axis=0, keepdims=True)       # sublane (XLU) reduce -> (1, TB)
    o_ref[...] = (acc + b_ref[0]).astype(o_ref.dtype)  # lane-dense unmasked store


def _batch_tile(B, block_b, align):
    """Batch tile: whole batch when small; else a large `align`-aligned tile
    capped at ceil(B/2) so the 'parallel' grid axis has >= 2 steps (v7x has
    2 TensorCores; each half should still be >= 512 rows, hence the 1024 cut)."""
    block_b = max(align, (block_b // align) * align)
    if B <= 1024:
        return B
    half = -(-B // 2)                       # ceil(B/2)
    half = -(-half // align) * align        # round up to a multiple of `align`
    return min(block_b, half)


def linear_pallas(x, weight, bias, *, block_b=4096):
    """y = x @ weight.T + bias.  x: (B, K) f32; weight: (N, K) (PyTorch layout, N == 1)."""
    B, K = x.shape
    N = weight.shape[0]
    assert weight.shape == (N, K) and bias.shape == (N,) and N == 1

    tb = _batch_tile(B, block_b, align=8)   # batch rows sit on sublanes -> multiple of 8
    grid = (pl.cdiv(B, tb),)

    return pl.pallas_call(
        _rows_kernel,
        out_shape=jax.ShapeDtypeStruct((B, N), x.dtype),
        grid=grid,
        in_specs=[
            pl.BlockSpec((tb, K), lambda i: (i, 0)),            # x: tiled over batch
            pl.BlockSpec((N, K), lambda i: (0, 0)),             # weight row: grid-invariant
            pl.BlockSpec(memory_space=pltpu.MemorySpace.SMEM),  # bias: SMEM scalar
        ],
        out_specs=pl.BlockSpec((tb, N), lambda i: (i, 0)),
        compiler_params=pltpu.CompilerParams(
            # Batch tiles are independent -> shard the grid across TCs (v7x megacore).
            dimension_semantics=("parallel",),
        ),
    )(x, weight, bias)


def linear_pallas_batch_on_lanes(x_t, weight, bias, *, block_b=32768):
    """Same op, lane-dense layout.  x_t: (K, B) = x.T handed over by the producer."""
    K, B = x_t.shape
    N = weight.shape[0]
    assert weight.shape == (N, K) and bias.shape == (N,) and N == 1

    # (1, K) -> (K, 1) is a free reshape (identical row-major bytes) because N == 1.
    w_col = weight.reshape(K, N)

    tb = _batch_tile(B, block_b, align=128)  # batch sits on lanes -> multiple of 128
    grid = (pl.cdiv(B, tb),)

    y_t = pl.pallas_call(
        _lanes_kernel,
        out_shape=jax.ShapeDtypeStruct((N, B), x_t.dtype),
        grid=grid,
        in_specs=[
            pl.BlockSpec((K, tb), lambda i: (0, i)),            # x^T: batch on lanes
            pl.BlockSpec((K, N), lambda i: (0, 0)),             # weight column: grid-invariant
            pl.BlockSpec(memory_space=pltpu.MemorySpace.SMEM),  # bias: SMEM scalar
        ],
        out_specs=pl.BlockSpec((N, tb), lambda i: (0, i)),      # lane-dense output slab
        compiler_params=pltpu.CompilerParams(
            dimension_semantics=("parallel",),
        ),
    )(x_t, w_col, bias)
    # (1, B) -> (B, 1) is a free reshape (same row-major layout).
    return y_t.reshape(B, N)


if __name__ == "__main__":
    key = jax.random.PRNGKey(0)
    k_x, k_w, k_b = jax.random.split(key, 3)

    B, K, N = 2, 10, 1  # batch=2, in_features=10, out_features=1

    # Deterministic init mimicking PyTorch Linear's U(-1/sqrt(K), 1/sqrt(K)).
    bound = 1.0 / jnp.sqrt(jnp.float32(K))
    weight = jax.random.uniform(k_w, (N, K), jnp.float32, -bound, bound)  # (out, in)
    bias = jax.random.uniform(k_b, (N,), jnp.float32, -bound, bound)
    x = jax.random.normal(k_x, (B, K), jnp.float32)

    # Reference: y = x @ W.T + b (PyTorch semantics).
    y_ref = x @ weight.T + bias

    # Path 1: module-native (B, K) layout -- what CustomModel.forward receives.
    y = jax.block_until_ready(linear_pallas(x, weight, bias))
    assert y.shape == (B, N)
    assert jnp.allclose(y, y_ref, atol=1e-5, rtol=1e-5)

    # Path 2: lane-dense batch-on-lanes layout (producer hands x over transposed).
    y2 = jax.block_until_ready(linear_pallas_batch_on_lanes(x.T, weight, bias))
    assert y2.shape == (B, N)
    assert jnp.allclose(y2, y_ref, atol=1e-5, rtol=1e-5)

    print("KERNEL_OK")
</pallas_src>

<mosaic_0001>
module attributes {stable_mosaic.version = 11 : i64} {
  func.func @_rows_kernel(%arg0: i32, %arg1: memref<2x10xf32, #tpu.memory_space<vmem>>, %arg2: memref<1x10xf32, #tpu.memory_space<vmem>>, %arg3: memref<1xf32, #tpu.memory_space<smem>>, %arg4: memref<2x1xf32, #tpu.memory_space<vmem>>) attributes {dimension_semantics = [#tpu.dimension_semantics<parallel>], iteration_bounds = array<i64: 1>, scalar_prefetch = 0 : i64, scratch_operands = 0 : i64, tpu.core_type = #tpu.core_type<tc>, window_params = [{transform_indices = @transform_0, window_bounds = array<i64: 2, 10>}, {pipeline_mode = #tpu.pipeline_mode<synchronous>, transform_indices = @transform_1, window_bounds = array<i64: 1, 10>}, {transform_indices = @transform_2, window_bounds = array<i64: 1>}, {transform_indices = @transform_3, window_bounds = array<i64: 2, 1>}]} {
    %c0 = arith.constant 0 : index
    %c0_0 = arith.constant 0 : index
    %0 = vector.load %arg1[%c0, %c0_0] : memref<2x10xf32, #tpu.memory_space<vmem>>, vector<2x10xf32>
    %c0_1 = arith.constant 0 : index
    %c0_2 = arith.constant 0 : index
    %1 = vector.load %arg2[%c0_1, %c0_2] : memref<1x10xf32, #tpu.memory_space<vmem>>, vector<1x10xf32>
    %2 = vector.broadcast %1 : vector<1x10xf32> to vector<2x10xf32>
    %3 = arith.mulf %0, %2 : vector<2x10xf32>
    %cst = arith.constant dense<0.000000e+00> : vector<2xf32>
    %4 = vector.multi_reduction <add>, %3, %cst [1] : vector<2x10xf32> to vector<2xf32>
    %5 = vector.shape_cast %4 : vector<2xf32> to vector<2x1xf32>
    %c0_3 = arith.constant 0 : index
    %6 = memref.load %arg3[%c0_3] : memref<1xf32, #tpu.memory_space<smem>>
    %7 = vector.broadcast %6 : f32 to vector<2x1xf32>
    %8 = arith.addf %5, %7 : vector<2x1xf32>
    %c0_4 = arith.constant 0 : index
    %c0_5 = arith.constant 0 : index
    %9 = vector.load %arg4[%c0_4, %c0_5] : memref<2x1xf32, #tpu.memory_space<vmem>>, vector<2x1xf32>
    tpu.vector_store %arg4[%c0_4, %c0_5], %8 {strides = array<i32>} : memref<2x1xf32, #tpu.memory_space<vmem>>, vector<2x1xf32>,
    return
  }
  func.func @transform_0(%arg0: i32) -> (i32, i32) {
    %c0_i32 = arith.constant 0 : i32
    %c0_i32_0 = arith.constant 0 : i32
    return %arg0, %c0_i32 : i32, i32
  }
  func.func @transform_1(%arg0: i32) -> (i32, i32) {
    %c0_i32 = arith.constant 0 : i32
    %c0_i32_0 = arith.constant 0 : i32
    %c0_i32_1 = arith.constant 0 : i32
    return %c0_i32, %c0_i32_0 : i32, i32
  }
  func.func @transform_2(%arg0: i32) -> i32 {
    %c0_i32 = arith.constant 0 : i32
    %c0_i32_0 = arith.constant 0 : i32
    return %c0_i32 : i32
  }
  func.func @transform_3(%arg0: i32) -> (i32, i32) {
    %c0_i32 = arith.constant 0 : i32
    %c0_i32_0 = arith.constant 0 : i32
    return %arg0, %c0_i32 : i32, i32
  }
}

</mosaic_0001>

<bundles_post_ra>
// kernel: tpu_custom_call.1
= control target key start
LH: loop header
LB: loop body
LE: loop exit
PB: predicated region body
PF: predicated region fallthrough
CT: control target
= control target key end

     0   :  { %vm24_vm0 = vcmask 74752   ;;  %vm31_vm1 = vcmask 1024   ;;  %s70_s0 = inlined_call_operand.vmem [shape: f32[2,10], index: 0, kind: input, shape index: {}]   ;;  %s71_s1 = inlined_call_operand.vmem [shape: f32[1,10], index: 1, kind: input, shape index: {}]   ;;  %s72_s2 = inlined_call_operand.<no memory space> [shape: f32[1], index: 2, kind: input, shape index: {}]   ;;  %s73_s3 = inlined_call_operand.vmem [shape: f32[2,1], index: 3, kind: output, shape index: {}]  }
   0x1   :  { %v15_v0 = vld [vmem:[%s70_s0] sm:$0x3]  ;;  %v29_v4 = vstv %s72_s2 }
   0x2   :  { %v37_v1 = vld [vmem:[%s71_s1] ss:$0 sm:$0xff] }
   0x3   :  { %v23_v2 = vmul.f32 %v37_v1, %v15_v0 }
   0x5   :  { %v25_v3 = vsel %vm24_vm0, %v23_v2, 0.0 }
   0x6   :  { %26 = vadd.xlane.f32.xlu0 %v25_v3 }
  0x8f   :  { %v27_v5 = vpop.xlane.xlu0 %26 }
  0x90   :  { %v30_v6 = vadd.f32 %v29_v4, %v27_v5 }
  0x92   :  { %32 = vst.msk [vmem:[%s73_s3] sm:$0x3] %vm31_vm1, %v30_v6 }

</bundles_post_ra>
